<compile_context>
chip_gen: v5e
topology: v5e:2x2
jax: 0.10.0
libtpu: 0.0.40
codegen_flags: <defaults>
</compile_context>

<pallas_src>
import functools
import math

import jax
import jax.numpy as jnp
from jax.experimental import pallas as pl
from jax.experimental.pallas import tpu as pltpu

N_LAYERS_IN = 5     # numLayersInputSide
WIDTH_IN = 50       # widthInputSide
N_LAYERS_OUT = 5    # numLayersOutputSide
WIDTH_OUT = 50      # widthOutputSide

DEFAULT_B_TILE = 256  # point sets per grid step (fills MXU M on v6e/v7x; >=128 on v5e)


def _round_up(x, m):
    return ((x + m - 1) // m) * m


def _net_kernel(x_ref, w0_ref, b0_ref, wir_ref, bir_ref,
                worT_ref, borT_ref, wLT_ref, bL_ref, o_ref,
                *, b_tile, n_points, n_in_rest, n_out_rest):
    """One grid step == one tile of `b_tile` point sets (M = b_tile*n_points points).

    x_ref:    (M, 1)                      all points of this tile, set-major
    w0_ref:   (1, W_in)    b0_ref: (1, W_in)          first input-side layer
    wir_ref:  (L_in-1, W_in, W_in)        bir_ref: (L_in-1, 1, W_in)
    worT_ref: (L_out-1, W_out, W_in)      borT_ref: (L_out-1, W_out, 1)   (transposed)
    wLT_ref:  (1, W_out)   bL_ref: (1, 1)             final layer (transposed)
    o_ref:    (1, b_tile)                              lane-dense outputs for this tile
    """
    # ---- input side, applied per point ----
    # First layer has in_features == 1: VPU broadcast mul-add, not a K=1 matmul.
    h = jnp.maximum(x_ref[...] * w0_ref[...] + b0_ref[...], 0.0)          # (M, W_in)
    for i in range(n_in_rest):                                            # unrolled
        h = jnp.dot(h, wir_ref[i], preferred_element_type=jnp.float32) + bir_ref[i]
        h = jnp.maximum(h, 0.0)

    # ---- mean pool over each set's n_points points: (M, W) -> (b_tile, W) ----
    w = h.shape[-1]
    g = jnp.sum(h.reshape(b_tile, n_points, w), axis=1) * (1.0 / n_points)

    # ---- output side, run transposed (features x sets) so matmuls and the
    # final store are lane-dense over the b_tile sets ----
    gt = g.T                                                              # (W_in, b_tile)
    for i in range(n_out_rest):                                           # unrolled
        gt = jnp.dot(worT_ref[i], gt, preferred_element_type=jnp.float32) + borT_ref[i]
        gt = jnp.maximum(gt, 0.0)
    out = jnp.dot(wLT_ref[...], gt, preferred_element_type=jnp.float32) + bL_ref[...]
    o_ref[...] = out                                                      # (1, b_tile)


def net_forward(x, params, *, b_tile=DEFAULT_B_TILE):
    """x: (B, N, 1) float32.  Returns (B,) -- matches torch.cat(outputs, 0)."""
    B, N, _ = x.shape
    w0, b0, wir, bir, worT, borT, wLT, bL = params

    # Tile over point sets; don't over-pad tiny batches (bt always a multiple of 8).
    bt = min(b_tile, max(8, _round_up(B, 8)))
    T = pl.cdiv(B, bt)
    Bp = T * bt
    if Bp != B:
        # Zero-padded sets are computed but sliced off; each set is independent,
        # so padding cannot corrupt real outputs.
        x = jnp.pad(x, ((0, Bp - B), (0, 0), (0, 0)))
    x2 = x.reshape(Bp * N, 1)   # set-major flat column: contiguous (bt*N, 1) slab per step

    kernel = functools.partial(
        _net_kernel, b_tile=bt, n_points=N,
        n_in_rest=wir.shape[0], n_out_rest=worT.shape[0])

    def const_spec(arr):
        nd = arr.ndim
        # Full-extent block, constant index_map -> weights stay resident, DMA'd once.
        return pl.BlockSpec(arr.shape, lambda t, _nd=nd: (0,) * _nd)

    out = pl.pallas_call(
        kernel,
        out_shape=jax.ShapeDtypeStruct((T, 1, bt), jnp.float32),
        grid=(T,),
        in_specs=[
            pl.BlockSpec((bt * N, 1), lambda t: (t, 0)),
            const_spec(w0), const_spec(b0),
            const_spec(wir), const_spec(bir),
            const_spec(worT), const_spec(borT),
            const_spec(wLT), const_spec(bL),
        ],
        out_specs=pl.BlockSpec((pl.Squeezed(), 1, bt), lambda t: (t, 0, 0)),
        compiler_params=pltpu.CompilerParams(
            dimension_semantics=("parallel",)),
    )(x2, w0, b0, wir, bir, worT, borT, wLT, bL)
    return out.reshape(Bp)[:B]


def init_params(key):
    """Deterministic nn.Linear-style init (uniform(-1/sqrt(fan_in), +1/sqrt(fan_in)))."""
    def linear(kw, kb, fan_in, fan_out):
        bound = 1.0 / math.sqrt(fan_in)
        w = jax.random.uniform(kw, (fan_in, fan_out), jnp.float32, -bound, bound)
        b = jax.random.uniform(kb, (fan_out,), jnp.float32, -bound, bound)
        return w, b

    n_layers = N_LAYERS_IN + N_LAYERS_OUT
    keys = jax.random.split(key, 2 * n_layers)

    # input side: 1 -> W_in, then (W_in -> W_in) x (L_in - 1)
    in_ws, in_bs = [], []
    fan_in = 1
    for i in range(N_LAYERS_IN):
        w, b = linear(keys[2 * i], keys[2 * i + 1], fan_in, WIDTH_IN)
        in_ws.append(w); in_bs.append(b)
        fan_in = WIDTH_IN

    # output side: (W_in -> W_out) x (L_out - 1), then W_out -> 1
    out_ws, out_bs = [], []
    for i in range(N_LAYERS_OUT):
        fan_out = 1 if i == N_LAYERS_OUT - 1 else WIDTH_OUT
        k = 2 * (N_LAYERS_IN + i)
        w, b = linear(keys[k], keys[k + 1], fan_in, fan_out)
        out_ws.append(w); out_bs.append(b)
        fan_in = fan_out

    w0 = in_ws[0]                                        # (1, W_in)
    b0 = in_bs[0].reshape(1, WIDTH_IN)                   # (1, W_in)
    wir = jnp.stack(in_ws[1:])                           # (L_in-1, W_in, W_in)
    bir = jnp.stack(in_bs[1:]).reshape(-1, 1, WIDTH_IN)
    # Output side stored transposed (out_features, in_features) for the kernel's
    # lane-dense (features x sets) orientation.
    worT = jnp.stack([w.T for w in out_ws[:-1]])         # (L_out-1, W_out, W_in)
    borT = jnp.stack(out_bs[:-1]).reshape(-1, WIDTH_OUT, 1)
    wLT = out_ws[-1].T                                   # (1, W_out)
    bL = out_bs[-1].reshape(1, 1)                        # (1, 1)
    return (w0, b0, wir, bir, worT, borT, wLT, bL)


def reference(x, params):
    """Pure-JAX reference matching the torch forward."""
    w0, b0, wir, bir, worT, borT, wLT, bL = params
    h = jax.nn.relu(x @ w0 + b0)                         # (B, N, W_in)
    for i in range(wir.shape[0]):
        h = jax.nn.relu(h @ wir[i] + bir[i])
    g = jnp.mean(h, axis=1)                              # (B, W_in)
    for i in range(worT.shape[0]):
        g = jax.nn.relu(g @ worT[i].T + borT[i][:, 0])
    g = g @ wLT.T + bL[0]                                # (B, 1)
    return g.reshape(-1)                                 # (B,)


if __name__ == "__main__":
    key = jax.random.PRNGKey(0)
    k_param, k_x1, k_x2 = jax.random.split(key, 3)
    params = init_params(k_param)

    # Small check consistent with the torch forward (2 point sets, 8 points each).
    B, N = 2, 8
    x_small = jax.random.normal(k_x1, (B, N, 1), jnp.float32)
    out_small = jax.block_until_ready(net_forward(x_small, params))
    ref_small = reference(x_small, params)
    assert out_small.shape == (B,)
    assert jnp.allclose(out_small, ref_small, atol=1e-4, rtol=1e-4), (out_small, ref_small)

    # Larger batch exercising the real tile size (two 256-set tiles, M=2048 matmuls).
    B2 = 300
    x_big = jax.random.normal(k_x2, (B2, N, 1), jnp.float32)
    out_big = jax.block_until_ready(net_forward(x_big, params))
    ref_big = reference(x_big, params)
    assert out_big.shape == (B2,)
    assert jnp.allclose(out_big, ref_big, atol=1e-4, rtol=1e-4), (
        float(jnp.max(jnp.abs(out_big - ref_big))))

    print("KERNEL_OK")
</pallas_src>

<mosaic_0001>
module attributes {stable_mosaic.version = 11 : i64} {
  func.func @_net_kernel(%arg0: i32, %arg1: memref<64x1xf32, #tpu.memory_space<vmem>>, %arg2: memref<1x50xf32, #tpu.memory_space<vmem>>, %arg3: memref<1x50xf32, #tpu.memory_space<vmem>>, %arg4: memref<4x50x50xf32, #tpu.memory_space<vmem>>, %arg5: memref<4x1x50xf32, #tpu.memory_space<vmem>>, %arg6: memref<4x50x50xf32, #tpu.memory_space<vmem>>, %arg7: memref<4x50x1xf32, #tpu.memory_space<vmem>>, %arg8: memref<1x50xf32, #tpu.memory_space<vmem>>, %arg9: memref<1x1xf32, #tpu.memory_space<vmem>>, %arg10: memref<1x1x8xf32, #tpu.memory_space<vmem>>) attributes {dimension_semantics = [#tpu.dimension_semantics<parallel>], iteration_bounds = array<i64: 1>, scalar_prefetch = 0 : i64, scratch_operands = 0 : i64, tpu.core_type = #tpu.core_type<tc>, window_params = [{transform_indices = @transform_0, window_bounds = array<i64: 64, 1>}, {pipeline_mode = #tpu.pipeline_mode<synchronous>, transform_indices = @transform_1, window_bounds = array<i64: 1, 50>}, {pipeline_mode = #tpu.pipeline_mode<synchronous>, transform_indices = @transform_2, window_bounds = array<i64: 1, 50>}, {pipeline_mode = #tpu.pipeline_mode<synchronous>, transform_indices = @transform_3, window_bounds = array<i64: 4, 50, 50>}, {pipeline_mode = #tpu.pipeline_mode<synchronous>, transform_indices = @transform_4, window_bounds = array<i64: 4, 1, 50>}, {pipeline_mode = #tpu.pipeline_mode<synchronous>, transform_indices = @transform_5, window_bounds = array<i64: 4, 50, 50>}, {pipeline_mode = #tpu.pipeline_mode<synchronous>, transform_indices = @transform_6, window_bounds = array<i64: 4, 50, 1>}, {pipeline_mode = #tpu.pipeline_mode<synchronous>, transform_indices = @transform_7, window_bounds = array<i64: 1, 50>}, {pipeline_mode = #tpu.pipeline_mode<synchronous>, transform_indices = @transform_8, window_bounds = array<i64: 1, 1>}, {transform_indices = @transform_9, window_bounds = array<i64: 1, 1, 8>}]} {
    %c0 = arith.constant 0 : index
    %c0_0 = arith.constant 0 : index
    %0 = vector.load %arg1[%c0, %c0_0] : memref<64x1xf32, #tpu.memory_space<vmem>>, vector<64x1xf32>
    %c0_1 = arith.constant 0 : index
    %c0_2 = arith.constant 0 : index
    %1 = vector.load %arg2[%c0_1, %c0_2] : memref<1x50xf32, #tpu.memory_space<vmem>>, vector<1x50xf32>
    %2 = vector.broadcast %0 : vector<64x1xf32> to vector<64x50xf32>
    %3 = vector.broadcast %1 : vector<1x50xf32> to vector<64x50xf32>
    %4 = arith.mulf %2, %3 : vector<64x50xf32>
    %c0_3 = arith.constant 0 : index
    %c0_4 = arith.constant 0 : index
    %5 = vector.load %arg3[%c0_3, %c0_4] : memref<1x50xf32, #tpu.memory_space<vmem>>, vector<1x50xf32>
    %6 = vector.broadcast %5 : vector<1x50xf32> to vector<64x50xf32>
    %7 = arith.addf %4, %6 : vector<64x50xf32>
    %cst = arith.constant 0.000000e+00 : f32
    %8 = vector.broadcast %cst : f32 to vector<64x50xf32>
    %9 = arith.maximumf %7, %8 : vector<64x50xf32>
    %c0_5 = arith.constant 0 : index
    %c0_6 = arith.constant 0 : index
    %c0_7 = arith.constant 0 : index
    %10 = vector.load %arg4[%c0_5, %c0_6, %c0_7] : memref<4x50x50xf32, #tpu.memory_space<vmem>>, vector<1x50x50xf32>
    %11 = vector.shape_cast %10 : vector<1x50x50xf32> to vector<50x50xf32>
    %cst_8 = arith.constant dense<0.000000e+00> : vector<64x50xf32>
    %12 = tpu.matmul %9, %11, %cst_8 {dimension_numbers = #tpu.dot_dimension_numbers<[1], [0], [0], [1], [0, 0, 1, 1], [], []>} : vector<64x50xf32>, vector<50x50xf32>, vector<64x50xf32> -> vector<64x50xf32>
    %c0_9 = arith.constant 0 : index
    %c0_10 = arith.constant 0 : index
    %c0_11 = arith.constant 0 : index
    %13 = vector.load %arg5[%c0_9, %c0_10, %c0_11] : memref<4x1x50xf32, #tpu.memory_space<vmem>>, vector<1x1x50xf32>
    %14 = vector.shape_cast %13 : vector<1x1x50xf32> to vector<1x50xf32>
    %15 = vector.broadcast %14 : vector<1x50xf32> to vector<64x50xf32>
    %16 = arith.addf %12, %15 : vector<64x50xf32>
    %cst_12 = arith.constant 0.000000e+00 : f32
    %17 = vector.broadcast %cst_12 : f32 to vector<64x50xf32>
    %18 = arith.maximumf %16, %17 : vector<64x50xf32>
    %c1 = arith.constant 1 : index
    %c0_13 = arith.constant 0 : index
    %c0_14 = arith.constant 0 : index
    %19 = vector.load %arg4[%c1, %c0_13, %c0_14] : memref<4x50x50xf32, #tpu.memory_space<vmem>>, vector<1x50x50xf32>
    %20 = vector.shape_cast %19 : vector<1x50x50xf32> to vector<50x50xf32>
    %cst_15 = arith.constant dense<0.000000e+00> : vector<64x50xf32>
    %21 = tpu.matmul %18, %20, %cst_15 {dimension_numbers = #tpu.dot_dimension_numbers<[1], [0], [0], [1], [0, 0, 1, 1], [], []>} : vector<64x50xf32>, vector<50x50xf32>, vector<64x50xf32> -> vector<64x50xf32>
    %c1_16 = arith.constant 1 : index
    %c0_17 = arith.constant 0 : index
    %c0_18 = arith.constant 0 : index
    %22 = vector.load %arg5[%c1_16, %c0_17, %c0_18] : memref<4x1x50xf32, #tpu.memory_space<vmem>>, vector<1x1x50xf32>
    %23 = vector.shape_cast %22 : vector<1x1x50xf32> to vector<1x50xf32>
    %24 = vector.broadcast %23 : vector<1x50xf32> to vector<64x50xf32>
    %25 = arith.addf %21, %24 : vector<64x50xf32>
    %cst_19 = arith.constant 0.000000e+00 : f32
    %26 = vector.broadcast %cst_19 : f32 to vector<64x50xf32>
    %27 = arith.maximumf %25, %26 : vector<64x50xf32>
    %c2 = arith.constant 2 : index
    %c0_20 = arith.constant 0 : index
    %c0_21 = arith.constant 0 : index
    %28 = vector.load %arg4[%c2, %c0_20, %c0_21] : memref<4x50x50xf32, #tpu.memory_space<vmem>>, vector<1x50x50xf32>
    %29 = vector.shape_cast %28 : vector<1x50x50xf32> to vector<50x50xf32>
    %cst_22 = arith.constant dense<0.000000e+00> : vector<64x50xf32>
    %30 = tpu.matmul %27, %29, %cst_22 {dimension_numbers = #tpu.dot_dimension_numbers<[1], [0], [0], [1], [0, 0, 1, 1], [], []>} : vector<64x50xf32>, vector<50x50xf32>, vector<64x50xf32> -> vector<64x50xf32>
    %c2_23 = arith.constant 2 : index
    %c0_24 = arith.constant 0 : index
    %c0_25 = arith.constant 0 : index
    %31 = vector.load %arg5[%c2_23, %c0_24, %c0_25] : memref<4x1x50xf32, #tpu.memory_space<vmem>>, vector<1x1x50xf32>
    %32 = vector.shape_cast %31 : vector<1x1x50xf32> to vector<1x50xf32>
    %33 = vector.broadcast %32 : vector<1x50xf32> to vector<64x50xf32>
    %34 = arith.addf %30, %33 : vector<64x50xf32>
    %cst_26 = arith.constant 0.000000e+00 : f32
    %35 = vector.broadcast %cst_26 : f32 to vector<64x50xf32>
    %36 = arith.maximumf %34, %35 : vector<64x50xf32>
    %c3 = arith.constant 3 : index
    %c0_27 = arith.constant 0 : index
    %c0_28 = arith.constant 0 : index
    %37 = vector.load %arg4[%c3, %c0_27, %c0_28] : memref<4x50x50xf32, #tpu.memory_space<vmem>>, vector<1x50x50xf32>
    %38 = vector.shape_cast %37 : vector<1x50x50xf32> to vector<50x50xf32>
    %cst_29 = arith.constant dense<0.000000e+00> : vector<64x50xf32>
    %39 = tpu.matmul %36, %38, %cst_29 {dimension_numbers = #tpu.dot_dimension_numbers<[1], [0], [0], [1], [0, 0, 1, 1], [], []>} : vector<64x50xf32>, vector<50x50xf32>, vector<64x50xf32> -> vector<64x50xf32>
    %c3_30 = arith.constant 3 : index
    %c0_31 = arith.constant 0 : index
    %c0_32 = arith.constant 0 : index
    %40 = vector.load %arg5[%c3_30, %c0_31, %c0_32] : memref<4x1x50xf32, #tpu.memory_space<vmem>>, vector<1x1x50xf32>
    %41 = vector.shape_cast %40 : vector<1x1x50xf32> to vector<1x50xf32>
    %42 = vector.broadcast %41 : vector<1x50xf32> to vector<64x50xf32>
    %43 = arith.addf %39, %42 : vector<64x50xf32>
    %cst_33 = arith.constant 0.000000e+00 : f32
    %44 = vector.broadcast %cst_33 : f32 to vector<64x50xf32>
    %45 = arith.maximumf %43, %44 : vector<64x50xf32>
    %46 = vector.shape_cast %45 : vector<64x50xf32> to vector<8x8x50xf32>
    %cst_34 = arith.constant dense<0.000000e+00> : vector<8x50xf32>
    %47 = vector.multi_reduction <add>, %46, %cst_34 [1] : vector<8x8x50xf32> to vector<8x50xf32>
    %cst_35 = arith.constant 1.250000e-01 : f32
    %48 = vector.broadcast %cst_35 : f32 to vector<8x50xf32>
    %49 = arith.mulf %47, %48 : vector<8x50xf32>
    %50 = tpu.transpose %49, [1, 0] : vector<8x50xf32> -> vector<50x8xf32>
    %c0_36 = arith.constant 0 : index
    %c0_37 = arith.constant 0 : index
    %c0_38 = arith.constant 0 : index
    %51 = vector.load %arg6[%c0_36, %c0_37, %c0_38] : memref<4x50x50xf32, #tpu.memory_space<vmem>>, vector<1x50x50xf32>
    %52 = vector.shape_cast %51 : vector<1x50x50xf32> to vector<50x50xf32>
    %cst_39 = arith.constant dense<0.000000e+00> : vector<50x8xf32>
    %53 = tpu.matmul %52, %50, %cst_39 {dimension_numbers = #tpu.dot_dimension_numbers<[1], [0], [0], [1], [0, 0, 1, 1], [], []>} : vector<50x50xf32>, vector<50x8xf32>, vector<50x8xf32> -> vector<50x8xf32>
    %c0_40 = arith.constant 0 : index
    %c0_41 = arith.constant 0 : index
    %c0_42 = arith.constant 0 : index
    %54 = vector.load %arg7[%c0_40, %c0_41, %c0_42] : memref<4x50x1xf32, #tpu.memory_space<vmem>>, vector<1x50x1xf32>
    %55 = vector.shape_cast %54 : vector<1x50x1xf32> to vector<50x1xf32>
    %56 = vector.broadcast %55 : vector<50x1xf32> to vector<50x8xf32>
    %57 = arith.addf %53, %56 : vector<50x8xf32>
    %cst_43 = arith.constant 0.000000e+00 : f32
    %58 = vector.broadcast %cst_43 : f32 to vector<50x8xf32>
    %59 = arith.maximumf %57, %58 : vector<50x8xf32>
    %c1_44 = arith.constant 1 : index
    %c0_45 = arith.constant 0 : index
    %c0_46 = arith.constant 0 : index
    %60 = vector.load %arg6[%c1_44, %c0_45, %c0_46] : memref<4x50x50xf32, #tpu.memory_space<vmem>>, vector<1x50x50xf32>
    %61 = vector.shape_cast %60 : vector<1x50x50xf32> to vector<50x50xf32>
    %cst_47 = arith.constant dense<0.000000e+00> : vector<50x8xf32>
    %62 = tpu.matmul %61, %59, %cst_47 {dimension_numbers = #tpu.dot_dimension_numbers<[1], [0], [0], [1], [0, 0, 1, 1], [], []>} : vector<50x50xf32>, vector<50x8xf32>, vector<50x8xf32> -> vector<50x8xf32>
    %c1_48 = arith.constant 1 : index
    %c0_49 = arith.constant 0 : index
    %c0_50 = arith.constant 0 : index
    %63 = vector.load %arg7[%c1_48, %c0_49, %c0_50] : memref<4x50x1xf32, #tpu.memory_space<vmem>>, vector<1x50x1xf32>
    %64 = vector.shape_cast %63 : vector<1x50x1xf32> to vector<50x1xf32>
    %65 = vector.broadcast %64 : vector<50x1xf32> to vector<50x8xf32>
    %66 = arith.addf %62, %65 : vector<50x8xf32>
    %cst_51 = arith.constant 0.000000e+00 : f32
    %67 = vector.broadcast %cst_51 : f32 to vector<50x8xf32>
    %68 = arith.maximumf %66, %67 : vector<50x8xf32>
    %c2_52 = arith.constant 2 : index
    %c0_53 = arith.constant 0 : index
    %c0_54 = arith.constant 0 : index
    %69 = vector.load %arg6[%c2_52, %c0_53, %c0_54] : memref<4x50x50xf32, #tpu.memory_space<vmem>>, vector<1x50x50xf32>
    %70 = vector.shape_cast %69 : vector<1x50x50xf32> to vector<50x50xf32>
    %cst_55 = arith.constant dense<0.000000e+00> : vector<50x8xf32>
    %71 = tpu.matmul %70, %68, %cst_55 {dimension_numbers = #tpu.dot_dimension_numbers<[1], [0], [0], [1], [0, 0, 1, 1], [], []>} : vector<50x50xf32>, vector<50x8xf32>, vector<50x8xf32> -> vector<50x8xf32>
    %c2_56 = arith.constant 2 : index
    %c0_57 = arith.constant 0 : index
    %c0_58 = arith.constant 0 : index
    %72 = vector.load %arg7[%c2_56, %c0_57, %c0_58] : memref<4x50x1xf32, #tpu.memory_space<vmem>>, vector<1x50x1xf32>
    %73 = vector.shape_cast %72 : vector<1x50x1xf32> to vector<50x1xf32>
    %74 = vector.broadcast %73 : vector<50x1xf32> to vector<50x8xf32>
    %75 = arith.addf %71, %74 : vector<50x8xf32>
    %cst_59 = arith.constant 0.000000e+00 : f32
    %76 = vector.broadcast %cst_59 : f32 to vector<50x8xf32>
    %77 = arith.maximumf %75, %76 : vector<50x8xf32>
    %c3_60 = arith.constant 3 : index
    %c0_61 = arith.constant 0 : index
    %c0_62 = arith.constant 0 : index
    %78 = vector.load %arg6[%c3_60, %c0_61, %c0_62] : memref<4x50x50xf32, #tpu.memory_space<vmem>>, vector<1x50x50xf32>
    %79 = vector.shape_cast %78 : vector<1x50x50xf32> to vector<50x50xf32>
    %cst_63 = arith.constant dense<0.000000e+00> : vector<50x8xf32>
    %80 = tpu.matmul %79, %77, %cst_63 {dimension_numbers = #tpu.dot_dimension_numbers<[1], [0], [0], [1], [0, 0, 1, 1], [], []>} : vector<50x50xf32>, vector<50x8xf32>, vector<50x8xf32> -> vector<50x8xf32>
    %c3_64 = arith.constant 3 : index
    %c0_65 = arith.constant 0 : index
    %c0_66 = arith.constant 0 : index
    %81 = vector.load %arg7[%c3_64, %c0_65, %c0_66] : memref<4x50x1xf32, #tpu.memory_space<vmem>>, vector<1x50x1xf32>
    %82 = vector.shape_cast %81 : vector<1x50x1xf32> to vector<50x1xf32>
    %83 = vector.broadcast %82 : vector<50x1xf32> to vector<50x8xf32>
    %84 = arith.addf %80, %83 : vector<50x8xf32>
    %cst_67 = arith.constant 0.000000e+00 : f32
    %85 = vector.broadcast %cst_67 : f32 to vector<50x8xf32>
    %86 = arith.maximumf %84, %85 : vector<50x8xf32>
    %c0_68 = arith.constant 0 : index
    %c0_69 = arith.constant 0 : index
    %87 = vector.load %arg8[%c0_68, %c0_69] : memref<1x50xf32, #tpu.memory_space<vmem>>, vector<1x50xf32>
    %cst_70 = arith.constant dense<0.000000e+00> : vector<1x8xf32>
    %88 = tpu.matmul %87, %86, %cst_70 {dimension_numbers = #tpu.dot_dimension_numbers<[1], [0], [0], [1], [0, 0, 1, 1], [], []>} : vector<1x50xf32>, vector<50x8xf32>, vector<1x8xf32> -> vector<1x8xf32>
    %c0_71 = arith.constant 0 : index
    %c0_72 = arith.constant 0 : index
    %89 = vector.load %arg9[%c0_71, %c0_72] : memref<1x1xf32, #tpu.memory_space<vmem>>, vector<1x1xf32>
    %90 = vector.broadcast %89 : vector<1x1xf32> to vector<1x8xf32>
    %91 = arith.addf %88, %90 : vector<1x8xf32>
    %c0_73 = arith.constant 0 : index
    %c0_74 = arith.constant 0 : index
    %c0_75 = arith.constant 0 : index
    %92 = vector.load %arg10[%c0_73, %c0_74, %c0_75] : memref<1x1x8xf32, #tpu.memory_space<vmem>>, vector<1x1x8xf32>
    %93 = vector.shape_cast %92 : vector<1x1x8xf32> to vector<1x8xf32>
    %94 = vector.shape_cast %91 : vector<1x8xf32> to vector<1x1x8xf32>
    tpu.vector_store %arg10[%c0_73, %c0_74, %c0_75], %94 {strides = array<i32>} : memref<1x1x8xf32, #tpu.memory_space<vmem>>, vector<1x1x8xf32>,
    return
  }
  func.func @transform_0(%arg0: i32) -> (i32, i32) {
    %c0_i32 = arith.constant 0 : i32
    %c0_i32_0 = arith.constant 0 : i32
    return %arg0, %c0_i32 : i32, i32
  }
  func.func @transform_1(%arg0: i32) -> (i32, i32) {
    %c0_i32 = arith.constant 0 : i32
    %c0_i32_0 = arith.constant 0 : i32
    %c0_i32_1 = arith.constant 0 : i32
    return %c0_i32, %c0_i32_0 : i32, i32
  }
  func.func @transform_2(%arg0: i32) -> (i32, i32) {
    %c0_i32 = arith.constant 0 : i32
    %c0_i32_0 = arith.constant 0 : i32
    %c0_i32_1 = arith.constant 0 : i32
    return %c0_i32, %c0_i32_0 : i32, i32
  }
  func.func @transform_3(%arg0: i32) -> (i32, i32, i32) {
    %c0_i32 = arith.constant 0 : i32
    %c0_i32_0 = arith.constant 0 : i32
    %c0_i32_1 = arith.constant 0 : i32
    %c0_i32_2 = arith.constant 0 : i32
    return %c0_i32, %c0_i32_0, %c0_i32_1 : i32, i32, i32
  }
  func.func @transform_4(%arg0: i32) -> (i32, i32, i32) {
    %c0_i32 = arith.constant 0 : i32
    %c0_i32_0 = arith.constant 0 : i32
    %c0_i32_1 = arith.constant 0 : i32
    %c0_i32_2 = arith.constant 0 : i32
    return %c0_i32, %c0_i32_0, %c0_i32_1 : i32, i32, i32
  }
  func.func @transform_5(%arg0: i32) -> (i32, i32, i32) {
    %c0_i32 = arith.constant 0 : i32
    %c0_i32_0 = arith.constant 0 : i32
    %c0_i32_1 = arith.constant 0 : i32
    %c0_i32_2 = arith.constant 0 : i32
    return %c0_i32, %c0_i32_0, %c0_i32_1 : i32, i32, i32
  }
  func.func @transform_6(%arg0: i32) -> (i32, i32, i32) {
    %c0_i32 = arith.constant 0 : i32
    %c0_i32_0 = arith.constant 0 : i32
    %c0_i32_1 = arith.constant 0 : i32
    %c0_i32_2 = arith.constant 0 : i32
    return %c0_i32, %c0_i32_0, %c0_i32_1 : i32, i32, i32
  }
  func.func @transform_7(%arg0: i32) -> (i32, i32) {
    %c0_i32 = arith.constant 0 : i32
    %c0_i32_0 = arith.constant 0 : i32
    %c0_i32_1 = arith.constant 0 : i32
    return %c0_i32, %c0_i32_0 : i32, i32
  }
  func.func @transform_8(%arg0: i32) -> (i32, i32) {
    %c0_i32 = arith.constant 0 : i32
    %c0_i32_0 = arith.constant 0 : i32
    %c0_i32_1 = arith.constant 0 : i32
    return %c0_i32, %c0_i32_0 : i32, i32
  }
  func.func @transform_9(%arg0: i32) -> (i32, i32, i32) {
    %c0_i32 = arith.constant 0 : i32
    %c0_i32_0 = arith.constant 0 : i32
    %c0_i32_1 = arith.constant 0 : i32
    return %arg0, %c0_i32, %c0_i32_0 : i32, i32, i32
  }
}

</mosaic_0001>

<bundles_post_ra>
// kernel: tpu_custom_call.1
= control target key start
LH: loop header
LB: loop body
LE: loop exit
PB: predicated region body
PF: predicated region fallthrough
CT: control target
= control target key end

     0   :  { %s1692_s0 = inlined_call_operand.vmem [shape: f32[64,1], index: 0, kind: input, shape index: {}]   ;;  %s1693_s1 = inlined_call_operand.vmem [shape: f32[1,50], index: 1, kind: input, shape index: {}]   ;;  %s1694_s2 = inlined_call_operand.vmem [shape: f32[1,50], index: 2, kind: input, shape index: {}]   ;;  %s1695_s3 = inlined_call_operand.vmem [shape: f32[4,50,50], index: 3, kind: input, shape index: {}]   ;;  %s1696_s4 = inlined_call_operand.vmem [shape: f32[4,1,50], index: 4, kind: input, shape index: {}]   ;;  %s1697_s5 = inlined_call_operand.vmem [shape: f32[4,50,50], index: 5, kind: input, shape index: {}]   ;;  %s1698_s6 = inlined_call_operand.vmem [shape: f32[4,50,1], index: 6, kind: input, shape index: {}]   ;;  %s1699_s7 = inlined_call_operand.vmem [shape: f32[1,50], index: 7, kind: input, shape index: {}]   ;;  %s1700_s8 = inlined_call_operand.<no memory space> [shape: f32[1,1], index: 8, kind: input, shape index: {}]   ;;  %s1701_s9 = inlined_call_operand.hbm [shape: f32[1,1,8], index: 9, kind: output, shape index: {}]  }
   0x1   :  { %v14_v0 = vstv %s1700_s8 }
   0x2   :  { %15 = vst [vmem:[#allocation2] sm:$0x1] %v14_v0 }
   0x3   :  { %v39_v1 = vld [vmem:[%s1692_s0 + $0x20] sm:$0xff]  ;;  %v37_v2 = vld [vmem:[%s1692_s0 + $0x10] sm:$0xff]  ;;  %v1259_v4 = vmov 0   ;;  %v40_v5 = vld [vmem:[%s1692_s0 + $0x28] sm:$0xff] }
   0x4   :  { %v35_v3 = vld [vmem:[%s1692_s0] sm:$0xff]  ;;  %1226 = vset.pattern.permute.xlu2 %v1259_v4  ;;  %1225 = vset.pattern.permute.xlu1 %v1259_v4 }
   0x5   :  { %1224 = vset.pattern.permute.xlu0 %v1259_v4  ;;  %66 = vperm.xlu2 %1226, %v39_v1  }
   0x6   :  { %56 = vperm.xlu1 %1225, %v37_v2   ;;  %46 = vperm.xlu0 %1224, %v35_v3  }
   0x7   :  { %16 = vsyncpa [#allocation4], 0  ;;  %v38_v6 = vld [vmem:[%s1692_s0 + $0x18] sm:$0xff]  ;;  %v36_v7 = vld [vmem:[%s1692_s0 + $0x8] sm:$0xff]  ;;  %vm151_vm0 = vcmask 1041408   ;;  %vm126_vm1 = vcmask 408576  }
   0x8   :  { %v548_v8 = vld [vmem:[%s1698_s6 + $0x30] sm:$0x3]  ;;  %v42_v9 = vld [vmem:[%s1692_s0 + $0x38] sm:$0xff]  ;;  %v546_v12 = vld [vmem:[%s1698_s6 + $0x20] sm:$0xff]  ;;  %vm592_vm2 = vcmask 1041409   ;;  %vm594_vm3 = vcmask 1042434  }
   0x9   :  { %v41_v10 = vld [vmem:[%s1692_s0 + $0x30] sm:$0xff]  ;;  %v545_v11 = vld [vmem:[%s1698_s6 + $0x18] sm:$0xff]  ;;  %v547_v13 = vld [vmem:[%s1698_s6 + $0x28] sm:$0xff]  ;;  %vm596_vm4 = vcmask 1043459   ;;  %vm598_vm5 = vcmask 1044484   ;;  %vm600_vm6 = vcmask 1045509  }
   0xa   :  { %v542_v14 = vld [vmem:[%s1698_s6] sm:$0xff]  ;;  %v543_v15 = vld [vmem:[%s1698_s6 + $0x8] sm:$0xff]  ;;  %v544_v16 = vld [vmem:[%s1698_s6 + $0x10] sm:$0xff]  ;;  %vm602_vm7 = vcmask 1046534   ;;  %vm604_vm8 = vcmask 1047559   ;;  %s1260_s28 = smov [#allocation3]  }
   0xb   :  { %v1165_v17 = vld [vmem:[%s1698_s6 + $0x58] sm:$0xff]  ;;  %v1166_v18 = vld [vmem:[%s1698_s6 + $0x60] sm:$0xff]  ;;  %v1167_v19 = vld [vmem:[%s1698_s6 + $0x68] sm:$0x3]  ;;  %vm1068_vm9 = vcmask 57344  }
   0xc   :  { %v1162_v20 = vld [vmem:[%s1698_s6 + $0x40] sm:$0xff]  ;;  %v1163_v21 = vld [vmem:[%s1698_s6 + $0x48] sm:$0xff]  ;;  %v1164_v22 = vld [vmem:[%s1698_s6 + $0x50] sm:$0xff] }
   0xd   :  { %71 = vperm.xlu2 %1226, %v40_v5   ;;  %v1188_v23 = vld [vmem:[%s1698_s6 + $0x98] sm:$0xff]  ;;  %v1189_v24 = vld [vmem:[%s1698_s6 + $0xa0] sm:$0x3]  ;;  %v1186_v27 = vld [vmem:[%s1698_s6 + $0x88] sm:$0xff] }
   0xe   :  { %61 = vperm.xlu1 %1225, %v38_v6   ;;  %51 = vperm.xlu0 %1224, %v36_v7   ;;  %v1161_v25 = vld [vmem:[%s1698_s6 + $0x38] sm:$0xff]  ;;  %v1185_v26 = vld [vmem:[%s1698_s6 + $0x80] sm:$0xff]  ;;  %v1187_v28 = vld [vmem:[%s1698_s6 + $0x90] sm:$0xff] }
   0xf   :  { %v1211_v29 = vld [vmem:[%s1698_s6 + $0xd8] sm:$0x3]  ;;  %v1183_v30 = vld [vmem:[%s1698_s6 + $0x70] sm:$0xff]  ;;  %v120_v33 = vld [vmem:[%s1695_s3 + $0x28] sm:$0xff] }
  0x10   :  { %v1184_v31 = vld [vmem:[%s1698_s6 + $0x78] sm:$0xff]  ;;  %v121_v32 = vld [vmem:[%s1695_s3 + $0x30] sm:$0x3]  ;;  %v119_v34 = vld [vmem:[%s1695_s3 + $0x20] sm:$0xff] }
  0x11   :  { %1086 = vmatpush.msk.msra.mxu0 %vm151_vm0, %v121_v32  ;;  %v1208_v35 = vld [vmem:[%s1698_s6 + $0xc0] sm:$0xff]  ;;  %v1209_v36 = vld [vmem:[%s1698_s6 + $0xc8] sm:$0xff]  ;;  %v1210_v37 = vld [vmem:[%s1698_s6 + $0xd0] sm:$0xff] }
  0x12   :  { %v118_v38 = vld [vmem:[%s1695_s3 + $0x18] sm:$0xff]  ;;  %v117_v39 = vld [vmem:[%s1695_s3 + $0x10] sm:$0xff]  ;;  %v1205_v40 = vld [vmem:[%s1698_s6 + $0xa8] sm:$0xff] }
  0x13   :  { %165 = vmatpush.msra.mxu0 %v120_v33  ;;  %v1206_v41 = vld [vmem:[%s1698_s6 + $0xb0] sm:$0xff]  ;;  %v1207_v42 = vld [vmem:[%s1698_s6 + $0xb8] sm:$0xff]  ;;  %v116_v43 = vld [vmem:[%s1695_s3 + $0x8] sm:$0xff]  ;;  %s1075_s6 = sshll.u32 %s1260_s28, 4  ;;  %s1076_s6 = int_to_ptr.vmem [resolvable:$true] %s1075_s6 }
  0x14   :  { %v115_v44 = vld [vmem:[%s1695_s3] sm:$0xff] }
  0x15   :  { %581 = vperm.xlu2 %1226, %v548_v8   ;;  %166 = vmatpush.msra.mxu0 %v119_v34  ;;  %v1035_v45 = vld [vmem:[#allocation2] sm:$0x1] }
  0x16   :  { %81 = vperm.xlu1 %1225, %v42_v9   ;;  %76 = vperm.xlu0 %1224, %v41_v10   ;;  %v1227_v46 = vld [vmem:[%s1693_s1] ss:$0 sm:$0xff] }
  0x17   :  { %167 = vmatpush.msra.mxu0 %v118_v38  ;;  %v1228_v47 = vld [vmem:[%s1694_s2] ss:$0 sm:$0xff]  ;;  %v1116_v38 = vld [vmem:[%s1695_s3 + $0x90] sm:$0xff]  ;;  %s1077_s2 = sshll.u32 %s1701_s9, 4  ;;  %s1078_s2 = int_to_ptr.hbm [resolvable:$true] %s1077_s2 }
  0x19   :  { %168 = vmatpush.msra.mxu0 %v117_v39 }
  0x1b   :  { %169 = vmatpush.msra.mxu0 %v116_v43 }
  0x1d   :  { %566 = vperm.xlu2 %1226, %v545_v11   ;;  %170 = vmatpush.msra.mxu0 %v115_v44 }
  0x1e   :  { %571 = vperm.xlu1 %1225, %v546_v12   ;;  %576 = vperm.xlu0 %1224, %v547_v13  }
  0x25   :  { %551 = vperm.xlu2 %1226, %v542_v14  }
  0x26   :  { %556 = vperm.xlu1 %1225, %v543_v15   ;;  %561 = vperm.xlu0 %1224, %v544_v16   ;;  %v1101_v16 = vld [vmem:[%s1695_s3 + $0x68] sm:$0x3] }
  0x27   :  { %1103 = vmatpush.msk.msra.mxu1 %vm151_vm0, %v1101_v16 }
  0x2d   :  { %712 = vperm.xlu2 %1226, %v1165_v17   ;;  %v1100_v17 = vld [vmem:[%s1695_s3 + $0x60] sm:$0xff] }
  0x2e   :  { %717 = vperm.xlu1 %1225, %v1166_v18   ;;  %722 = vperm.xlu0 %1224, %v1167_v19   ;;  %v1099_v18 = vld [vmem:[%s1695_s3 + $0x58] sm:$0xff]  ;;  %v1098_v19 = vld [vmem:[%s1695_s3 + $0x50] sm:$0xff] }
  0x2f   :  { %254 = vmatpush.msra.mxu1 %v1100_v17 }
  0x31   :  { %255 = vmatpush.msra.mxu1 %v1099_v18 }
  0x33   :  { %256 = vmatpush.msra.mxu1 %v1098_v19 }
  0x35   :  { %697 = vperm.xlu2 %1226, %v1162_v20   ;;  %v1097_v20 = vld [vmem:[%s1695_s3 + $0x48] sm:$0xff] }
  0x36   :  { %702 = vperm.xlu1 %1225, %v1163_v21   ;;  %707 = vperm.xlu0 %1224, %v1164_v22   ;;  %v1096_v21 = vld [vmem:[%s1695_s3 + $0x40] sm:$0xff]  ;;  %v1095_v22 = vld [vmem:[%s1695_s3 + $0x38] sm:$0xff] }
  0x37   :  { %257 = vmatpush.msra.mxu1 %v1097_v20  ;;  %v1131_v20 = vld [vmem:[%s1695_s3 + $0xb8] sm:$0xff] }
  0x39   :  { %258 = vmatpush.msra.mxu1 %v1096_v21  ;;  %v1130_v21 = vld [vmem:[%s1695_s3 + $0xb0] sm:$0xff] }
  0x3b   :  { %259 = vmatpush.msra.mxu1 %v1095_v22  ;;  %v1129_v22 = vld [vmem:[%s1695_s3 + $0xa8] sm:$0xff] }
  0x3d   :  { %837 = vperm.xlu2 %1226, %v1188_v23   ;;  %v1229_v23 = vld [vmem:[%s1696_s4] ss:$0 sm:$0xff] }
  0x3e   :  { %842 = vperm.xlu1 %1225, %v1189_v24   ;;  %692 = vperm.xlu0 %1224, %v1161_v25  }
  0x45   :  { %822 = vperm.xlu2 %1226, %v1185_v26  }
  0x46   :  { %827 = vperm.xlu1 %1225, %v1186_v27   ;;  %832 = vperm.xlu0 %1224, %v1187_v28  }
  0x4d   :  { %962 = vperm.xlu2 %1226, %v1211_v29  }
  0x4e   :  { %812 = vperm.xlu1 %1225, %v1183_v30   ;;  %817 = vperm.xlu0 %1224, %v1184_v31  }
  0x55   :  { %947 = vperm.xlu2 %1226, %v1208_v35  }
  0x56   :  { %952 = vperm.xlu1 %1225, %v1209_v36   ;;  %957 = vperm.xlu0 %1224, %v1210_v37   ;;  %v1118_v36 = vld [vmem:[%s1695_s3 + $0xa0] sm:$0x3]  ;;  %v1117_v37 = vld [vmem:[%s1695_s3 + $0x98] sm:$0xff] }
  0x57   :  { %1120 = vmatpush.msk.msra.mxu2 %vm151_vm0, %v1118_v36 }
  0x59   :  { %343 = vmatpush.msra.mxu2 %v1117_v37 }
  0x5b   :  { %344 = vmatpush.msra.mxu2 %v1116_v38 }
  0x5d   :  { %932 = vperm.xlu2 %1226, %v1205_v40  }
  0x5e   :  { %937 = vperm.xlu1 %1225, %v1206_v41   ;;  %942 = vperm.xlu0 %1224, %v1207_v42   ;;  %v1115_v41 = vld [vmem:[%s1695_s3 + $0x88] sm:$0xff] }
  0x5f   :  { %v67_v63 = vpop.permute.xlu2 %66  ;;  %345 = vmatpush.msra.mxu2 %v1115_v41 }
  0x60   :  { %v91_v0 = vmul.f32 %v1227_v46, %v67_v63 }
  0x62   :  { %v103_v2 = vadd.f32 %v1228_v47, %v91_v0 }
  0x64   :  { %v111_v3 = vmax.f32 %v103_v2, 0.0 }
  0x66   :  { %1038 = vperm.xlu0 %1224, %v1035_v45  }
  0x67   :  { %v72_v4 = vpop.permute.xlu2 %71 }
  0x68   :  { %v92_v5 = vmul.f32 %v1227_v46, %v72_v4  ;;  %v1135_v4 = vld [vmem:[%s1695_s3 + $0xd8] sm:$0x3] }
  0x69   :  { %1137 = vmatpush.msk.msra.mxu3 %vm151_vm0, %v1135_v4 }
  0x6a   :  { %v104_v6 = vadd.f32 %v1228_v47, %v92_v5  ;;  %v1134_v5 = vld [vmem:[%s1695_s3 + $0xd0] sm:$0xff] }
  0x6b   :  { %432 = vmatpush.msra.mxu3 %v1134_v5 }
  0x6c   :  { %v112_v8 = vmax.f32 %v104_v6, 0.0  ;;  %v1133_v6 = vld [vmem:[%s1695_s3 + $0xc8] sm:$0xff] }
  0x6d   :  { %433 = vmatpush.msra.mxu3 %v1133_v6 }
  0x78   :  { %v47_v48 = vpop.permute.xlu0 %46  ;;  %v57_v54 = vpop.permute.xlu1 %56 }
  0x79   :  { %v87_v49 = vmul.f32 %v1227_v46, %v47_v48  ;;  %v89_v55 = vmul.f32 %v1227_v46, %v57_v54  ;;  %v1112_v54 = vld [vmem:[%s1695_s3 + $0x70] sm:$0xff] }
  0x7b   :  { %v99_v50 = vadd.f32 %v1228_v47, %v87_v49  ;;  %v101_v58 = vadd.f32 %v1228_v47, %v89_v55  ;;  %v1230_v55 = vld [vmem:[%s1696_s4 + $0x1] ss:$0 sm:$0xff] }
  0x7d   :  { %v107_v51 = vmax.f32 %v99_v50, 0.0  ;;  %v109_v59 = vmax.f32 %v101_v58, 0.0 }
  0x7f   :  { %1087 = vmatmul.msk.f32.vlgmr.msra.gmra.mxu0 %vm126_vm1, %v107_v51 }
  0x80   :  { %v52_v52 = vpop.permute.xlu0 %51  ;;  %v62_v60 = vpop.permute.xlu1 %61 }
  0x81   :  { %v88_v53 = vmul.f32 %v1227_v46, %v52_v52  ;;  %v90_v61 = vmul.f32 %v1227_v46, %v62_v60  ;;  %v1114_v52 = vld [vmem:[%s1695_s3 + $0x80] sm:$0xff] }
  0x82   :  { %346 = vmatpush.msra.mxu2 %v1114_v52  ;;  %v1232_v52 = vld [vmem:[%s1696_s4 + $0x3] ss:$0 sm:$0xff] }
  0x83   :  { %v100_v56 = vadd.f32 %v1228_v47, %v88_v53  ;;  %v102_v62 = vadd.f32 %v1228_v47, %v90_v61  ;;  %v1113_v53 = vld [vmem:[%s1695_s3 + $0x78] sm:$0xff] }
  0x84   :  { %347 = vmatpush.msra.mxu2 %v1113_v53 }
  0x85   :  { %v108_v57 = vmax.f32 %v100_v56, 0.0  ;;  %v110_v1 = vmax.f32 %v102_v62, 0.0 }
  0x86   :  { %348 = vmatpush.msra.mxu2 %v1112_v54 }
  0x87   :  { %1088 = vmatmul.msk.f32.gmra.mxu0 %vm126_vm1, %v108_v57 }
  0x88   :  { %v77_v7 = vpop.permute.xlu0 %76  ;;  %v82_v11 = vpop.permute.xlu1 %81 }
  0x89   :  { %v93_v9 = vmul.f32 %v1227_v46, %v77_v7  ;;  %v94_v12 = vmul.f32 %v1227_v46, %v82_v11 }
  0x8b   :  { %v105_v10 = vadd.f32 %v1228_v47, %v93_v9  ;;  %v106_v14 = vadd.f32 %v1228_v47, %v94_v12  ;;  %v1132_v9 = vld [vmem:[%s1695_s3 + $0xc0] sm:$0xff] }
  0x8c   :  { %434 = vmatpush.msra.mxu3 %v1132_v9 }
  0x8d   :  { %v113_v13 = vmax.f32 %v105_v10, 0.0  ;;  %v114_v15 = vmax.f32 %v106_v14, 0.0 }
  0x8e   :  { %435 = vmatpush.msra.mxu3 %v1131_v20 }
  0x8f   :  { %1089 = vmatmul.msk.f32.gmra.mxu0 %vm126_vm1, %v109_v59 }
  0x90   :  { %436 = vmatpush.msra.mxu3 %v1130_v21 }
  0x92   :  { %437 = vmatpush.msra.mxu3 %v1129_v22 }
  0x97   :  { %1090 = vmatmul.msk.f32.gmra.mxu0 %vm126_vm1, %v110_v1 }
  0x9f   :  { %1091 = vmatmul.msk.f32.gmra.mxu0 %vm126_vm1, %v111_v3 }
  0xa7   :  { %1092 = vmatmul.msk.f32.gmra.mxu0 %vm126_vm1, %v112_v8 }
  0xaf   :  { %1093 = vmatmul.msk.f32.gmra.mxu0 %vm126_vm1, %v113_v13 }
  0xb7   :  { %1094 = vmatmul.msk.f32.gmra.mxu0 %vm126_vm1, %v114_v15 }
  0xfc   :  { %v172_v24 = vpop.f32.mrf.mxu0 }
  0xfd   :  { %v173_v25 = vadd.f32 %v1229_v23, %v172_v24 }
  0xff   :  { %v196_v26 = vmax.f32 %v173_v25, 0.0 }
 0x101   :  { %1104 = vmatmul.msk.f32.vlgmr.msra.gmra.mxu1 %vm126_vm1, %v196_v26 }
 0x104   :  { %v175_v27 = vpop.f32.mrf.mxu0 }
 0x105   :  { %v176_v28 = vadd.f32 %v1229_v23, %v175_v27 }
 0x107   :  { %v197_v29 = vmax.f32 %v176_v28, 0.0 }
 0x109   :  { %1105 = vmatmul.msk.f32.gmra.mxu1 %vm126_vm1, %v197_v29 }
 0x10c   :  { %v178_v30 = vpop.f32.mrf.mxu0 }
 0x10d   :  { %v179_v31 = vadd.f32 %v1229_v23, %v178_v30 }
 0x10f   :  { %v198_v32 = vmax.f32 %v179_v31, 0.0 }
 0x111   :  { %1106 = vmatmul.msk.f32.gmra.mxu1 %vm126_vm1, %v198_v32 }
 0x114   :  { %v181_v33 = vpop.f32.mrf.mxu0 }
 0x115   :  { %v182_v34 = vadd.f32 %v1229_v23, %v181_v33 }
 0x117   :  { %v199_v35 = vmax.f32 %v182_v34, 0.0 }
 0x119   :  { %1107 = vmatmul.msk.f32.gmra.mxu1 %vm126_vm1, %v199_v35 }
 0x11c   :  { %v184_v39 = vpop.f32.mrf.mxu0 }
 0x11d   :  { %v185_v40 = vadd.f32 %v1229_v23, %v184_v39 }
 0x11f   :  { %v200_v42 = vmax.f32 %v185_v40, 0.0 }
 0x121   :  { %1108 = vmatmul.msk.f32.gmra.mxu1 %vm126_vm1, %v200_v42 }
 0x124   :  { %v187_v43 = vpop.f32.mrf.mxu0 }
 0x125   :  { %v188_v44 = vadd.f32 %v1229_v23, %v187_v43 }
 0x127   :  { %v201_v45 = vmax.f32 %v188_v44, 0.0 }
 0x129   :  { %1109 = vmatmul.msk.f32.gmra.mxu1 %vm126_vm1, %v201_v45 }
 0x12c   :  { %v190_v46 = vpop.f32.mrf.mxu0 }
 0x12d   :  { %v191_v47 = vadd.f32 %v1229_v23, %v190_v46 }
 0x12f   :  { %v202_v48 = vmax.f32 %v191_v47, 0.0 }
 0x131   :  { %1110 = vmatmul.msk.f32.gmra.mxu1 %vm126_vm1, %v202_v48 }
 0x134   :  { %v193_v49 = vpop.f32.mrf.mxu0 }
 0x135   :  { %v194_v50 = vadd.f32 %v1229_v23, %v193_v49  ;;  %v1231_v23 = vld [vmem:[%s1696_s4 + $0x2] ss:$0 sm:$0xff] }
 0x137   :  { %v203_v51 = vmax.f32 %v194_v50, 0.0 }
 0x139   :  { %1111 = vmatmul.msk.f32.gmra.mxu1 %vm126_vm1, %v203_v51 }
 0x17e   :  { %v261_v56 = vpop.f32.mrf.mxu1 }
 0x17f   :  { %v262_v57 = vadd.f32 %v1230_v55, %v261_v56 }
 0x181   :  { %v285_v58 = vmax.f32 %v262_v57, 0.0 }
 0x183   :  { %1121 = vmatmul.msk.f32.vlgmr.msra.gmra.mxu2 %vm126_vm1, %v285_v58 }
 0x186   :  { %v264_v59 = vpop.f32.mrf.mxu1 }
 0x187   :  { %v265_v60 = vadd.f32 %v1230_v55, %v264_v59 }
 0x189   :  { %v286_v61 = vmax.f32 %v265_v60, 0.0 }
 0x18b   :  { %1122 = vmatmul.msk.f32.gmra.mxu2 %vm126_vm1, %v286_v61 }
 0x18e   :  { %v267_v62 = vpop.f32.mrf.mxu1 }
 0x18f   :  { %v268_v63 = vadd.f32 %v1230_v55, %v267_v62 }
 0x191   :  { %v287_v0 = vmax.f32 %v268_v63, 0.0 }
 0x193   :  { %1123 = vmatmul.msk.f32.gmra.mxu2 %vm126_vm1, %v287_v0 }
 0x196   :  { %v270_v1 = vpop.f32.mrf.mxu1 }
 0x197   :  { %v271_v2 = vadd.f32 %v1230_v55, %v270_v1 }
 0x199   :  { %v288_v3 = vmax.f32 %v271_v2, 0.0 }
 0x19b   :  { %1124 = vmatmul.msk.f32.gmra.mxu2 %vm126_vm1, %v288_v3 }
 0x19e   :  { %v273_v7 = vpop.f32.mrf.mxu1 }
 0x19f   :  { %v274_v8 = vadd.f32 %v1230_v55, %v273_v7 }
 0x1a1   :  { %v289_v10 = vmax.f32 %v274_v8, 0.0 }
 0x1a3   :  { %1125 = vmatmul.msk.f32.gmra.mxu2 %vm126_vm1, %v289_v10 }
 0x1a6   :  { %v276_v11 = vpop.f32.mrf.mxu1 }
 0x1a7   :  { %v277_v12 = vadd.f32 %v1230_v55, %v276_v11 }
 0x1a9   :  { %v290_v13 = vmax.f32 %v277_v12, 0.0 }
 0x1ab   :  { %1126 = vmatmul.msk.f32.gmra.mxu2 %vm126_vm1, %v290_v13 }
 0x1ae   :  { %v279_v14 = vpop.f32.mrf.mxu1 }
 0x1af   :  { %v280_v15 = vadd.f32 %v1230_v55, %v279_v14 }
 0x1b1   :  { %v291_v16 = vmax.f32 %v280_v15, 0.0 }
 0x1b3   :  { %1127 = vmatmul.msk.f32.gmra.mxu2 %vm126_vm1, %v291_v16 }
 0x1b6   :  { %v282_v17 = vpop.f32.mrf.mxu1 }
 0x1b7   :  { %v283_v18 = vadd.f32 %v1230_v55, %v282_v17 }
 0x1b9   :  { %v292_v19 = vmax.f32 %v283_v18, 0.0 }
 0x1bb   :  { %1128 = vmatmul.msk.f32.gmra.mxu2 %vm126_vm1, %v292_v19 }
 0x206   :  { %v350_v24 = vpop.f32.mrf.mxu2 }
 0x207   :  { %v351_v25 = vadd.f32 %v1231_v23, %v350_v24 }
 0x209   :  { %v374_v26 = vmax.f32 %v351_v25, 0.0 }
 0x20b   :  { %1138 = vmatmul.msk.f32.vlgmr.msra.gmra.mxu3 %vm126_vm1, %v374_v26 }
 0x20e   :  { %v353_v27 = vpop.f32.mrf.mxu2 }
 0x20f   :  { %v354_v28 = vadd.f32 %v1231_v23, %v353_v27 }
 0x211   :  { %v375_v29 = vmax.f32 %v354_v28, 0.0 }
 0x213   :  { %1139 = vmatmul.msk.f32.gmra.mxu3 %vm126_vm1, %v375_v29 }
 0x216   :  { %v356_v30 = vpop.f32.mrf.mxu2 }
 0x217   :  { %v357_v31 = vadd.f32 %v1231_v23, %v356_v30 }
 0x219   :  { %v376_v32 = vmax.f32 %v357_v31, 0.0 }
 0x21b   :  { %1140 = vmatmul.msk.f32.gmra.mxu3 %vm126_vm1, %v376_v32 }
 0x21e   :  { %v359_v33 = vpop.f32.mrf.mxu2 }
 0x21f   :  { %v360_v34 = vadd.f32 %v1231_v23, %v359_v33 }
 0x221   :  { %v377_v35 = vmax.f32 %v360_v34, 0.0 }
 0x223   :  { %1141 = vmatmul.msk.f32.gmra.mxu3 %vm126_vm1, %v377_v35 }
 0x226   :  { %v362_v36 = vpop.f32.mrf.mxu2 }
 0x227   :  { %v363_v37 = vadd.f32 %v1231_v23, %v362_v36 }
 0x229   :  { %v378_v38 = vmax.f32 %v363_v37, 0.0 }
 0x22b   :  { %1142 = vmatmul.msk.f32.gmra.mxu3 %vm126_vm1, %v378_v38 }
 0x22e   :  { %v365_v39 = vpop.f32.mrf.mxu2 }
 0x22f   :  { %v366_v40 = vadd.f32 %v1231_v23, %v365_v39 }
 0x231   :  { %v379_v41 = vmax.f32 %v366_v40, 0.0 }
 0x233   :  { %1143 = vmatmul.msk.f32.gmra.mxu3 %vm126_vm1, %v379_v41 }
 0x236   :  { %v368_v42 = vpop.f32.mrf.mxu2 }
 0x237   :  { %v369_v43 = vadd.f32 %v1231_v23, %v368_v42 }
 0x239   :  { %v380_v44 = vmax.f32 %v369_v43, 0.0 }
 0x23b   :  { %1144 = vmatmul.msk.f32.gmra.mxu3 %vm126_vm1, %v380_v44 }
 0x23e   :  { %v371_v45 = vpop.f32.mrf.mxu2 }
 0x23f   :  { %v372_v46 = vadd.f32 %v1231_v23, %v371_v45 }
 0x241   :  { %v381_v47 = vmax.f32 %v372_v46, 0.0 }
 0x243   :  { %1145 = vmatmul.msk.f32.gmra.mxu3 %vm126_vm1, %v381_v47 }
 0x28e   :  { %v439_v48 = vpop.f32.mrf.mxu3 }
 0x28f   :  { %v440_v56 = vadd.f32 %v1232_v52, %v439_v48 }
 0x291   :  { %v463_v61 = vmax.f32 %v440_v56, 0.0 }
 0x293   :  { %v471_v3 = vsel %vm126_vm1, %v463_v61, 0.0 }
 0x294   :  { %v472_v10 = vrot.slane %v471_v3, 4 }
 0x296   :  { %v442_v49 = vpop.f32.mrf.mxu3  ;;  %v473_v17 = vadd.f32 %v472_v10, %v471_v3 }
 0x297   :  { %v443_v53 = vadd.f32 %v1232_v52, %v442_v49 }
 0x298   :  { %v474_v26 = vrot.slane %v473_v17, 2 }
 0x299   :  { %v464_v59 = vmax.f32 %v443_v53, 0.0 }
 0x29a   :  { %v475_v34 = vadd.f32 %v474_v26, %v473_v17  ;;  %v536_v17 = vld [vmem:[%s1697_s5 + $0x8] sm:$0xff] }
 0x29b   :  { %v478_v0 = vsel %vm126_vm1, %v464_v59, 0.0 }
 0x29c   :  { %v479_v6 = vrot.slane %v478_v0, 4  ;;  %v476_v45 = vrot.slane %v475_v34, 1 }
 0x29e   :  { %v445_v50 = vpop.f32.mrf.mxu3  ;;  %v480_v14 = vadd.f32 %v479_v6, %v478_v0  ;;  %v477_v56 = vadd.f32 %v476_v45, %v475_v34 }
 0x29f   :  { %v446_v54 = vadd.f32 %v1232_v52, %v445_v50 }
 0x2a0   :  { %v481_v22 = vrot.slane %v480_v14, 2  ;;  %v527_v0 = vmul.f32 0.125, %v477_v56  ;;  %v1158_v56 = vld [vmem:[%s1697_s5 + $0x58] sm:$0xff] }
 0x2a1   :  { %v465_v60 = vmax.f32 %v446_v54, 0.0 }
 0x2a2   :  { %v482_v30 = vadd.f32 %v481_v22, %v480_v14  ;;  %v541_v22 = vld [vmem:[%s1697_s5 + $0x30] sm:$0x3] }
 0x2a3   :  { %v485_v1 = vsel %vm126_vm1, %v465_v60, 0.0 }
 0x2a4   :  { %v486_v8 = vrot.slane %v485_v1, 4  ;;  %v483_v40 = vrot.slane %v482_v30, 1 }
 0x2a6   :  { %v448_v51 = vpop.f32.mrf.mxu3  ;;  %v487_v16 = vadd.f32 %v486_v8, %v485_v1  ;;  %v484_v50 = vadd.f32 %v483_v40, %v482_v30  ;;  %v577_v30 = vpop.permute.xlu0 %576 }
 0x2a7   :  { %v449_v57 = vadd.f32 %v1232_v52, %v448_v51 }
 0x2a8   :  { %v488_v24 = vrot.slane %v487_v16, 2  ;;  %v528_v59 = vmul.f32 0.125, %v484_v50 }
 0x2a9   :  { %v466_v62 = vmax.f32 %v449_v57, 0.0 }
 0x2aa   :  { %v489_v33 = vadd.f32 %v488_v24, %v487_v16  ;;  %v535_v16 = vld [vmem:[%s1697_s5] sm:$0xff] }
 0x2ab   :  { %v492_v4 = vsel %vm126_vm1, %v466_v62, 0.0 }
 0x2ac   :  { %v493_v11 = vrot.slane %v492_v4, 4  ;;  %v490_v43 = vrot.slane %v489_v33, 1 }
 0x2ae   :  { %v451_v55 = vpop.f32.mrf.mxu3  ;;  %v494_v18 = vadd.f32 %v493_v11, %v492_v4  ;;  %v491_v54 = vadd.f32 %v490_v43, %v489_v33  ;;  %v593_v4 = vsel %vm592_vm2, %v528_v59, %v527_v0  ;;  %v562_v40 = vpop.permute.xlu0 %561 }
 0x2af   :  { %v452_v58 = vadd.f32 %v1232_v52, %v451_v55 }
 0x2b0   :  { %v495_v27 = vrot.slane %v494_v18, 2  ;;  %v529_v62 = vmul.f32 0.125, %v491_v54  ;;  %v1156_v54 = vld [vmem:[%s1697_s5 + $0x48] sm:$0xff] }
 0x2b1   :  { %v467_v63 = vmax.f32 %v452_v58, 0.0 }
 0x2b2   :  { %v496_v35 = vadd.f32 %v495_v27, %v494_v18  ;;  %v595_v8 = vsel %vm594_vm3, %v529_v62, %v593_v4  ;;  %v537_v18 = vld [vmem:[%s1697_s5 + $0x10] sm:$0xff] }
 0x2b3   :  { %v499_v7 = vsel %vm126_vm1, %v467_v63, 0.0 }
 0x2b4   :  { %v500_v12 = vrot.slane %v499_v7, 4  ;;  %v497_v46 = vrot.slane %v496_v35, 1 }
 0x2b6   :  { %v454_v2 = vpop.f32.mrf.mxu3  ;;  %v501_v20 = vadd.f32 %v500_v12, %v499_v7  ;;  %v498_v57 = vadd.f32 %v497_v46, %v496_v35 }
 0x2b7   :  { %v455_v5 = vadd.f32 %v1232_v52, %v454_v2 }
 0x2b8   :  { %v502_v28 = vrot.slane %v501_v20, 2  ;;  %v530_v1 = vmul.f32 0.125, %v498_v57  ;;  %v1159_v57 = vld [vmem:[%s1697_s5 + $0x60] sm:$0xff] }
 0x2b9   :  { %v468_v9 = vmax.f32 %v455_v5, 0.0 }
 0x2ba   :  { %v503_v38 = vadd.f32 %v502_v28, %v501_v20  ;;  %v597_v10 = vsel %vm596_vm4, %v530_v1, %v595_v8  ;;  %v539_v20 = vld [vmem:[%s1697_s5 + $0x20] sm:$0xff]  ;;  %v582_v28 = vpop.permute.xlu2 %581 }
 0x2bb   :  { %v506_v13 = vsel %vm126_vm1, %v468_v9, 0.0 }
 0x2bc   :  { %v507_v15 = vrot.slane %v506_v13, 4  ;;  %v504_v48 = vrot.slane %v503_v38, 1 }
 0x2be   :  { %v457_v19 = vpop.f32.mrf.mxu3  ;;  %v508_v23 = vadd.f32 %v507_v15, %v506_v13 }
 0x2bf   :  { %v458_v21 = vadd.f32 %v1232_v52, %v457_v19  ;;  %v538_v19 = vld [vmem:[%s1697_s5 + $0x18] sm:$0xff] }
 0x2c0   :  { %v509_v31 = vrot.slane %v508_v23, 2 }
 0x2c1   :  { %v469_v25 = vmax.f32 %v458_v21, 0.0  ;;  %v540_v21 = vld [vmem:[%s1697_s5 + $0x28] sm:$0xff] }
 0x2c2   :  { %v510_v41 = vadd.f32 %v509_v31, %v508_v23  ;;  %v572_v31 = vpop.permute.xlu1 %571 }
 0x2c3   :  { %v513_v29 = vsel %vm126_vm1, %v469_v25, 0.0 }
 0x2c4   :  { %v514_v32 = vrot.slane %v513_v29, 4  ;;  %v511_v51 = vrot.slane %v510_v41, 1 }
 0x2c6   :  { %v515_v36 = vadd.f32 %v514_v32, %v513_v29  ;;  %v460_v37 = vpop.f32.mrf.mxu3  ;;  %v512_v60 = vadd.f32 %v511_v51, %v510_v41  ;;  %v567_v32 = vpop.permute.xlu2 %566  ;;  %v1154_v51 = vld [vmem:[%s1697_s5 + $0x38] sm:$0xff] }
 0x2c7   :  { %v461_v39 = vadd.f32 %v1232_v52, %v460_v37  ;;  %v505_v52 = vadd.f32 %v504_v48, %v503_v38 }
 0x2c8   :  { %v516_v42 = vrot.slane %v515_v36, 2  ;;  %v532_v5 = vmul.f32 0.125, %v512_v60 }
 0x2c9   :  { %v470_v44 = vmax.f32 %v461_v39, 0.0  ;;  %v531_v3 = vmul.f32 0.125, %v505_v52 }
 0x2ca   :  { %v517_v47 = vadd.f32 %v516_v42, %v515_v36  ;;  %v557_v43 = vpop.permute.xlu1 %556 }
 0x2cb   :  { %v520_v49 = vsel %vm126_vm1, %v470_v44, 0.0  ;;  %v599_v11 = vsel %vm598_vm5, %v531_v3, %v597_v10 }
 0x2cc   :  { %v521_v53 = vrot.slane %v520_v49, 4  ;;  %v518_v55 = vrot.slane %v517_v47, 1  ;;  %v601_v13 = vsel %vm600_vm6, %v532_v5, %v599_v11 }
 0x2ce   :  { %v522_v58 = vadd.f32 %v521_v53, %v520_v49  ;;  %v519_v63 = vadd.f32 %v518_v55, %v517_v47  ;;  %v552_v46 = vpop.permute.xlu2 %551  ;;  %v1155_v53 = vld [vmem:[%s1697_s5 + $0x40] sm:$0xff]  ;;  %v1157_v55 = vld [vmem:[%s1697_s5 + $0x50] sm:$0xff] }
 0x2d0   :  { %v523_v61 = vrot.slane %v522_v58, 2  ;;  %v533_v7 = vmul.f32 0.125, %v519_v63  ;;  %v723_v63 = vpop.permute.xlu0 %722 }
 0x2d2   :  { %v524_v2 = vadd.f32 %v523_v61, %v522_v58  ;;  %v603_v14 = vsel %vm602_vm7, %v533_v7, %v601_v13  ;;  %v1160_v58 = vld [vmem:[%s1697_s5 + $0x68] sm:$0x3]  ;;  %v718_v1 = vpop.permute.xlu1 %717 }
 0x2d4   :  { %v525_v6 = vrot.slane %v524_v2, 1 }
 0x2d6   :  { %v526_v9 = vadd.f32 %v525_v6, %v524_v2  ;;  %v713_v2 = vpop.permute.xlu2 %712 }
 0x2d8   :  { %v534_v12 = vmul.f32 0.125, %v526_v9  ;;  %v708_v3 = vpop.permute.xlu0 %707 }
 0x2da   :  { %v605_v15 = vsel %vm604_vm8, %v534_v12, %v603_v14  ;;  %v703_v11 = vpop.permute.xlu1 %702 }
 0x2db   :  { %1146 = vmatpush.xpose.msk.msrb.mxu0 %vm126_vm1, %v605_v15 }
 0x2de   :  { %1147 = vmatmul.msk.f32.vlgmr.msrb.gmra.mxu0 %vm126_vm1, %v535_v16  ;;  %v698_v14 = vpop.permute.xlu2 %697 }
 0x2e6   :  { %1148 = vmatmul.msk.f32.gmra.mxu0 %vm126_vm1, %v536_v17  ;;  %v693_v17 = vpop.permute.xlu0 %692 }
 0x2ee   :  { %1149 = vmatmul.msk.f32.gmra.mxu0 %vm126_vm1, %v537_v18 }
 0x2f6   :  { %1150 = vmatmul.msk.f32.gmra.mxu0 %vm126_vm1, %v538_v19 }
 0x2fe   :  { %1151 = vmatmul.msk.f32.gmra.mxu0 %vm126_vm1, %v539_v20 }
 0x306   :  { %1152 = vmatmul.msk.f32.gmra.mxu0 %vm126_vm1, %v540_v21 }
 0x30e   :  { %1153 = vmatmul.msk.f32.gmra.mxu0 %vm126_vm1, %v541_v22  ;;  %v1176_v22 = vld [vmem:[%s1697_s5 + $0x70] sm:$0xff] }
 0x35b   :  { %v646_v23 = vpop.f32.mrf.mxu0 }
 0x35c   :  { %v647_v47 = vadd.f32 %v646_v23, %v552_v46  ;;  %v1177_v23 = vld [vmem:[%s1697_s5 + $0x78] sm:$0xff] }
 0x35e   :  { %v667_v50 = vmax.f32 %v647_v47, 0.0 }
 0x363   :  { %v649_v24 = vpop.f32.mrf.mxu0 }
 0x364   :  { %v650_v44 = vadd.f32 %v649_v24, %v557_v43  ;;  %v1178_v24 = vld [vmem:[%s1697_s5 + $0x80] sm:$0xff] }
 0x366   :  { %v668_v49 = vmax.f32 %v650_v44, 0.0 }
 0x36b   :  { %v652_v25 = vpop.f32.mrf.mxu0 }
 0x36c   :  { %v653_v41 = vadd.f32 %v652_v25, %v562_v40  ;;  %v1179_v25 = vld [vmem:[%s1697_s5 + $0x88] sm:$0xff] }
 0x36e   :  { %v669_v48 = vmax.f32 %v653_v41, 0.0 }
 0x373   :  { %v655_v26 = vpop.f32.mrf.mxu0 }
 0x374   :  { %v656_v38 = vadd.f32 %v655_v26, %v567_v32  ;;  %v1180_v26 = vld [vmem:[%s1697_s5 + $0x90] sm:$0xff] }
 0x376   :  { %v670_v45 = vmax.f32 %v656_v38, 0.0 }
 0x37b   :  { %v658_v27 = vpop.f32.mrf.mxu0 }
 0x37c   :  { %v659_v36 = vadd.f32 %v658_v27, %v572_v31  ;;  %v1181_v27 = vld [vmem:[%s1697_s5 + $0x98] sm:$0xff] }
 0x37e   :  { %v671_v42 = vmax.f32 %v659_v36, 0.0  ;;  %v838_v36 = vpop.permute.xlu2 %837 }
 0x383   :  { %v661_v29 = vpop.f32.mrf.mxu0 }
 0x384   :  { %v662_v34 = vadd.f32 %v661_v29, %v577_v30 }
 0x386   :  { %v672_v39 = vmax.f32 %v662_v34, 0.0  ;;  %v843_v34 = vpop.permute.xlu1 %842  ;;  %v823_v46 = vpop.permute.xlu2 %822 }
 0x38b   :  { %v664_v33 = vpop.f32.mrf.mxu0 }
 0x38c   :  { %v665_v35 = vadd.f32 %v664_v33, %v582_v28  ;;  %v1182_v28 = vld [vmem:[%s1697_s5 + $0xa0] sm:$0x3] }
 0x38e   :  { %v673_v37 = vmax.f32 %v665_v35, 0.0  ;;  %v828_v38 = vpop.permute.xlu1 %827 }
 0x390   :  { %1168 = vmatpush.msk.msrb.mxu1 %vm151_vm0, %v673_v37  ;;  %v833_v37 = vpop.permute.xlu0 %832 }
 0x392   :  { %759 = vmatpush.msrb.mxu1 %v672_v39 }
 0x394   :  { %760 = vmatpush.msrb.mxu1 %v671_v42 }
 0x396   :  { %761 = vmatpush.msrb.mxu1 %v670_v45 }
 0x398   :  { %762 = vmatpush.msrb.mxu1 %v669_v48 }
 0x39a   :  { %763 = vmatpush.msrb.mxu1 %v668_v49  ;;  %v818_v49 = vpop.permute.xlu0 %817 }
 0x39c   :  { %764 = vmatpush.msrb.mxu1 %v667_v50 }
 0x39d   :  { %1169 = vmatmul.msk.f32.vlgmr.msrb.gmra.mxu1 %vm126_vm1, %v1154_v51 }
 0x3a5   :  { %1170 = vmatmul.msk.f32.gmra.mxu1 %vm126_vm1, %v1155_v53  ;;  %v813_v53 = vpop.permute.xlu1 %812 }
 0x3ad   :  { %1171 = vmatmul.msk.f32.gmra.mxu1 %vm126_vm1, %v1156_v54 }
 0x3b5   :  { %1172 = vmatmul.msk.f32.gmra.mxu1 %vm126_vm1, %v1157_v55 }
 0x3bd   :  { %1173 = vmatmul.msk.f32.gmra.mxu1 %vm126_vm1, %v1158_v56 }
 0x3c5   :  { %1174 = vmatmul.msk.f32.gmra.mxu1 %vm126_vm1, %v1159_v57 }
 0x3cd   :  { %1175 = vmatmul.msk.f32.gmra.mxu1 %vm126_vm1, %v1160_v58  ;;  %v1198_v58 = vld [vmem:[%s1697_s5 + $0xa8] sm:$0xff] }
 0x41a   :  { %v766_v52 = vpop.f32.mrf.mxu1 }
 0x41b   :  { %v767_v18 = vadd.f32 %v766_v52, %v693_v17  ;;  %v1199_v52 = vld [vmem:[%s1697_s5 + $0xb0] sm:$0xff] }
 0x41d   :  { %v787_v21 = vmax.f32 %v767_v18, 0.0 }
 0x422   :  { %v769_v59 = vpop.f32.mrf.mxu1 }
 0x423   :  { %v770_v15 = vadd.f32 %v769_v59, %v698_v14  ;;  %v1200_v59 = vld [vmem:[%s1697_s5 + $0xb8] sm:$0xff] }
 0x425   :  { %v788_v20 = vmax.f32 %v770_v15, 0.0 }
 0x42a   :  { %v772_v60 = vpop.f32.mrf.mxu1 }
 0x42b   :  { %v773_v12 = vadd.f32 %v772_v60, %v703_v11  ;;  %v1201_v60 = vld [vmem:[%s1697_s5 + $0xc0] sm:$0xff] }
 0x42d   :  { %v789_v19 = vmax.f32 %v773_v12, 0.0 }
 0x432   :  { %v775_v61 = vpop.f32.mrf.mxu1 }
 0x433   :  { %v776_v9 = vadd.f32 %v775_v61, %v708_v3  ;;  %v1202_v61 = vld [vmem:[%s1697_s5 + $0xc8] sm:$0xff] }
 0x435   :  { %v790_v16 = vmax.f32 %v776_v9, 0.0 }
 0x43a   :  { %v778_v62 = vpop.f32.mrf.mxu1 }
 0x43b   :  { %v779_v7 = vadd.f32 %v778_v62, %v713_v2  ;;  %v1203_v62 = vld [vmem:[%s1697_s5 + $0xd0] sm:$0xff] }
 0x43d   :  { %v791_v13 = vmax.f32 %v779_v7, 0.0  ;;  %v958_v7 = vpop.permute.xlu0 %957 }
 0x442   :  { %v781_v0 = vpop.f32.mrf.mxu1 }
 0x443   :  { %v782_v5 = vadd.f32 %v781_v0, %v718_v1 }
 0x445   :  { %v792_v10 = vmax.f32 %v782_v5, 0.0  ;;  %v963_v5 = vpop.permute.xlu2 %962  ;;  %v943_v17 = vpop.permute.xlu0 %942 }
 0x44a   :  { %v784_v4 = vpop.f32.mrf.mxu1 }
 0x44b   :  { %v785_v6 = vadd.f32 %v784_v4, %v723_v63  ;;  %v1204_v63 = vld [vmem:[%s1697_s5 + $0xd8] sm:$0x3] }
 0x44d   :  { %v793_v8 = vmax.f32 %v785_v6, 0.0  ;;  %v948_v9 = vpop.permute.xlu2 %947 }
 0x44f   :  { %1190 = vmatpush.msk.msrb.mxu2 %vm151_vm0, %v793_v8  ;;  %v953_v8 = vpop.permute.xlu1 %952 }
 0x451   :  { %879 = vmatpush.msrb.mxu2 %v792_v10 }
 0x453   :  { %880 = vmatpush.msrb.mxu2 %v791_v13 }
 0x455   :  { %881 = vmatpush.msrb.mxu2 %v790_v16 }
 0x457   :  { %882 = vmatpush.msrb.mxu2 %v789_v19 }
 0x459   :  { %883 = vmatpush.msrb.mxu2 %v788_v20  ;;  %v938_v20 = vpop.permute.xlu1 %937 }
 0x45b   :  { %884 = vmatpush.msrb.mxu2 %v787_v21 }
 0x45c   :  { %1191 = vmatmul.msk.f32.vlgmr.msrb.gmra.mxu2 %vm126_vm1, %v1176_v22 }
 0x464   :  { %1192 = vmatmul.msk.f32.gmra.mxu2 %vm126_vm1, %v1177_v23  ;;  %v933_v23 = vpop.permute.xlu2 %932 }
 0x46c   :  { %1193 = vmatmul.msk.f32.gmra.mxu2 %vm126_vm1, %v1178_v24 }
 0x474   :  { %1194 = vmatmul.msk.f32.gmra.mxu2 %vm126_vm1, %v1179_v25 }
 0x47c   :  { %1195 = vmatmul.msk.f32.gmra.mxu2 %vm126_vm1, %v1180_v26 }
 0x484   :  { %1196 = vmatmul.msk.f32.gmra.mxu2 %vm126_vm1, %v1181_v27 }
 0x48c   :  { %1197 = vmatmul.msk.f32.gmra.mxu2 %vm126_vm1, %v1182_v28  ;;  %v1034_v28 = vld [vmem:[%s1699_s7] sm:$0x1] }
 0x4df   :  { %v886_v29 = vpop.f32.mrf.mxu2 }
 0x4e0   :  { %v887_v54 = vadd.f32 %v886_v29, %v813_v53  ;;  %v1039_v29 = vpop.permute.xlu0 %1038 }
 0x4e2   :  { %v907_v57 = vmax.f32 %v887_v54, 0.0 }
 0x4e7   :  { %v889_v30 = vpop.f32.mrf.mxu2 }
 0x4e8   :  { %v890_v50 = vadd.f32 %v889_v30, %v818_v49  ;;  %v1041_v30 = vperm.slane %v1039_v29, 0 }
 0x4ea   :  { %v908_v56 = vmax.f32 %v890_v50, 0.0 }
 0x4ef   :  { %v892_v31 = vpop.f32.mrf.mxu2 }
 0x4f0   :  { %v893_v47 = vadd.f32 %v892_v31, %v823_v46 }
 0x4f2   :  { %v909_v55 = vmax.f32 %v893_v47, 0.0 }
 0x4f7   :  { %v895_v32 = vpop.f32.mrf.mxu2 }
 0x4f8   :  { %v896_v44 = vadd.f32 %v895_v32, %v828_v38 }
 0x4fa   :  { %v910_v51 = vmax.f32 %v896_v44, 0.0 }
 0x4ff   :  { %v898_v33 = vpop.f32.mrf.mxu2 }
 0x500   :  { %v899_v42 = vadd.f32 %v898_v33, %v833_v37 }
 0x502   :  { %v911_v48 = vmax.f32 %v899_v42, 0.0 }
 0x507   :  { %v901_v35 = vpop.f32.mrf.mxu2 }
 0x508   :  { %v902_v40 = vadd.f32 %v901_v35, %v838_v36 }
 0x50a   :  { %v912_v45 = vmax.f32 %v902_v40, 0.0 }
 0x50f   :  { %v904_v39 = vpop.f32.mrf.mxu2 }
 0x510   :  { %v905_v41 = vadd.f32 %v904_v39, %v843_v34 }
 0x512   :  { %v913_v43 = vmax.f32 %v905_v41, 0.0 }
 0x514   :  { %1212 = vmatpush.msk.msrb.mxu3 %vm151_vm0, %v913_v43 }
 0x516   :  { %999 = vmatpush.msrb.mxu3 %v912_v45 }
 0x518   :  { %1000 = vmatpush.msrb.mxu3 %v911_v48 }
 0x51a   :  { %1001 = vmatpush.msrb.mxu3 %v910_v51 }
 0x51c   :  { %1002 = vmatpush.msrb.mxu3 %v909_v55 }
 0x51e   :  { %1003 = vmatpush.msrb.mxu3 %v908_v56 }
 0x520   :  { %1004 = vmatpush.msrb.mxu3 %v907_v57 }
 0x521   :  { %1213 = vmatmul.msk.f32.vlgmr.msrb.gmra.mxu3 %vm126_vm1, %v1198_v58 }
 0x529   :  { %1214 = vmatmul.msk.f32.gmra.mxu3 %vm126_vm1, %v1199_v52 }
 0x531   :  { %1215 = vmatmul.msk.f32.gmra.mxu3 %vm126_vm1, %v1200_v59 }
 0x539   :  { %1216 = vmatmul.msk.f32.gmra.mxu3 %vm126_vm1, %v1201_v60 }
 0x541   :  { %1217 = vmatmul.msk.f32.gmra.mxu3 %vm126_vm1, %v1202_v61 }
 0x549   :  { %1218 = vmatmul.msk.f32.gmra.mxu3 %vm126_vm1, %v1203_v62 }
 0x551   :  { %1219 = vmatmul.msk.f32.gmra.mxu3 %vm126_vm1, %v1204_v63 }
 0x5a4   :  { %v1006_v0 = vpop.f32.mrf.mxu3 }
 0x5a5   :  { %v1007_v24 = vadd.f32 %v1006_v0, %v933_v23 }
 0x5a7   :  { %v1027_v27 = vmax.f32 %v1007_v24, 0.0 }
 0x5ac   :  { %v1009_v1 = vpop.f32.mrf.mxu3 }
 0x5ad   :  { %v1010_v21 = vadd.f32 %v1009_v1, %v938_v20 }
 0x5af   :  { %v1028_v26 = vmax.f32 %v1010_v21, 0.0 }
 0x5b4   :  { %v1012_v2 = vpop.f32.mrf.mxu3 }
 0x5b5   :  { %v1013_v18 = vadd.f32 %v1012_v2, %v943_v17 }
 0x5b7   :  { %v1029_v25 = vmax.f32 %v1013_v18, 0.0 }
 0x5bc   :  { %v1015_v3 = vpop.f32.mrf.mxu3 }
 0x5bd   :  { %v1016_v15 = vadd.f32 %v1015_v3, %v948_v9 }
 0x5bf   :  { %v1030_v22 = vmax.f32 %v1016_v15, 0.0 }
 0x5c4   :  { %v1018_v4 = vpop.f32.mrf.mxu3 }
 0x5c5   :  { %v1019_v13 = vadd.f32 %v1018_v4, %v953_v8 }
 0x5c7   :  { %v1031_v19 = vmax.f32 %v1019_v13, 0.0 }
 0x5cc   :  { %v1021_v6 = vpop.f32.mrf.mxu3 }
 0x5cd   :  { %v1022_v11 = vadd.f32 %v1021_v6, %v958_v7 }
 0x5cf   :  { %v1032_v16 = vmax.f32 %v1022_v11, 0.0 }
 0x5d4   :  { %v1024_v10 = vpop.f32.mrf.mxu3 }
 0x5d5   :  { %v1025_v12 = vadd.f32 %v1024_v10, %v963_v5 }
 0x5d7   :  { %v1033_v14 = vmax.f32 %v1025_v12, 0.0 }
 0x5d9   :  { %1220 = vmatpush.msk.msra.mxu0 %vm151_vm0, %v1033_v14 }
 0x5db   :  { %1058 = vmatpush.msra.mxu0 %v1032_v16 }
 0x5dd   :  { %1059 = vmatpush.msra.mxu0 %v1031_v19 }
 0x5df   :  { %1060 = vmatpush.msra.mxu0 %v1030_v22 }
 0x5e1   :  { %1061 = vmatpush.msra.mxu0 %v1029_v25 }
 0x5e3   :  { %1062 = vmatpush.msra.mxu0 %v1028_v26 }
 0x5e5   :  { %1063 = vmatpush.msra.mxu0 %v1027_v27 }
 0x5e6   :  { %1221 = vmatmul.msk.f32.vlgmr.msra.gmra.mxu0 %vm126_vm1, %v1034_v28 }
 0x663   :  { %v1065_v31 = vpop.f32.mrf.mxu0 }
 0x664   :  { %v1066_v32 = vadd.f32 %v1065_v31, %v1041_v30 }
 0x666   :  { %1069 = vst.msk [vmem:[#allocation3] sm:$0x1] %vm1068_vm9, %v1066_v32 }
 0x667   :  { %1080 = dma.vmem_to_hbm [thread:$0]  %s1076_s6, 16, %s1078_s2, [#allocation4]  }
 0x668   :  { %1257 = dma.done.wait [#allocation4], 16  }
 0x669   :  { %1258 = vsyncadd [#allocation4], 4294967280 }
 0x66a   :  { %1085 = vsyncpa [#allocation4], 1 }

</bundles_post_ra>
